<compile_context>
chip_gen: v6e
topology: v6e:2x2x1
jax: 0.10.0
libtpu: 0.0.40
codegen_flags: <defaults>
</compile_context>

<pallas_src>
import functools

import jax
import jax.numpy as jnp
from jax.experimental import pallas as pl
from jax.experimental.pallas import tpu as pltpu


def encoder_layer_kernel(
    x_full_ref, x_q_ref, mask_ref,
    wq_ref, bq_ref, wk_ref, bk_ref, wv_ref, bv_ref, wo_ref, bo_ref,
    g1_ref, be1_ref,
    w1_ref, b1_ref, w2_ref, b2_ref,
    g2_ref, be2_ref,
    out_ref, attn_ref,
    acc_ref,
    *, eps: float,
):
    h = pl.program_id(2)
    num_heads = pl.num_programs(2)

    x_full = x_full_ref[0]                       # (S,  D) f32 — key/value source
    x_q = x_q_ref[0]                             # (Tq, D) f32 — query tile / residual
    xf_bf = x_full.astype(jnp.bfloat16)
    xq_bf = x_q.astype(jnp.bfloat16)

    # Per-head projections (contraction dim = D; bf16 MXU inputs, f32 accum).
    # The per-head weight slabs are resident in VMEM; `ref[h]` is a cheap
    # dynamic leading-axis index.  1/sqrt(Dh) is already folded into wq/bq.
    q = jnp.dot(xq_bf, wq_ref[h], preferred_element_type=jnp.float32) + bq_ref[h]  # (Tq, Dh)
    k = jnp.dot(xf_bf, wk_ref[h], preferred_element_type=jnp.float32) + bk_ref[h]  # (S,  Dh)
    v = jnp.dot(xf_bf, wv_ref[h], preferred_element_type=jnp.float32) + bv_ref[h]  # (S,  Dh)

    # scores = q @ k^T expressed as a contraction on the last dim of both
    # operands, so no XLU transpose of k is materialized.
    scores = jax.lax.dot_general(
        q.astype(jnp.bfloat16), k.astype(jnp.bfloat16),
        dimension_numbers=(((1,), (1,)), ((), ())),
        preferred_element_type=jnp.float32)                                        # (Tq, S)
    scores = jnp.where(mask_ref[0] == 0.0, jnp.float32(-1e9), scores)

    # Numerically-stable softmax in f32; divide via the EUP reciprocal slot.
    m = jnp.max(scores, axis=-1, keepdims=True)
    e = jnp.exp(scores - m)
    p = e * pl.reciprocal(jnp.sum(e, axis=-1, keepdims=True), approx=True)          # (Tq, S)

    attn_ref[0, 0] = p                                                              # one slab store

    ctx = jnp.dot(p.astype(jnp.bfloat16), v.astype(jnp.bfloat16),
                  preferred_element_type=jnp.float32)                               # (Tq, Dh)

    # Partial attention-output projection for this head; accumulate over the
    # head grid axis (replaces concat + one big Wo matmul).
    part = jnp.dot(ctx.astype(jnp.bfloat16), wo_ref[h],
                   preferred_element_type=jnp.float32)                              # (Tq, D)

    @pl.when(h == 0)
    def _init():
        acc_ref[...] = jnp.broadcast_to(bo_ref[...], acc_ref.shape)

    acc_ref[...] += part

    # Finalize once every head is accumulated: residual + LN1 + FFN + residual
    # + LN2 (dropout1/dropout2 are identity in eval mode).
    @pl.when(h == num_heads - 1)
    def _finalize():
        def layer_norm(y, gamma, beta):
            mu = jnp.mean(y, axis=-1, keepdims=True)
            var = jnp.maximum(jnp.mean(y * y, axis=-1, keepdims=True) - mu * mu, 0.0)
            return (y - mu) * jax.lax.rsqrt(var + eps) * gamma + beta

        x1 = layer_norm(x_q + acc_ref[...], g1_ref[...], be1_ref[...])              # (Tq, D)

        h1 = jnp.dot(x1.astype(jnp.bfloat16), w1_ref[...],
                     preferred_element_type=jnp.float32) + b1_ref[...]
        h1 = jnp.maximum(h1, 0.0)                                                   # ReLU
        ffn = jnp.dot(h1.astype(jnp.bfloat16), w2_ref[...],
                      preferred_element_type=jnp.float32) + b2_ref[...]

        out_ref[0] = layer_norm(x1 + ffn, g2_ref[...], be2_ref[...])


def encoder_layer(x, mask, params, *, num_heads, eps=1e-6, q_tile=128):
    B, S, D = x.shape
    H = num_heads
    assert D % H == 0
    Dh = D // H
    Dff = params["w1"].shape[1]

    # Query-tile the sequence axis (second, parallel grid axis).  K/V are
    # recomputed per query tile; this bounds VMEM for the (Tq, S) scores and
    # (Tq, Dff) FFN activations at large S.
    Tq = q_tile if (S % q_tile == 0) else S
    n_qt = S // Tq

    scale = 1.0 / float(Dh) ** 0.5
    bf16, f32 = jnp.bfloat16, jnp.float32

    # Head-split the weights in the wrapper (plain XLA, once) so the kernel
    # never lane-slices / reshapes / transposes activations.
    def split_w(w):            # (D, D) -> (H, D, Dh)
        return jnp.transpose(w.reshape(D, H, Dh), (1, 0, 2))

    def split_b(b):            # (1, D) -> (H, 1, Dh)
        return jnp.transpose(b.reshape(1, H, Dh), (1, 0, 2))

    wq_h = split_w(params["wq"] * scale).astype(bf16)   # fold 1/sqrt(Dh) into Q
    bq_h = split_b(params["bq"] * scale).astype(f32)
    wk_h = split_w(params["wk"]).astype(bf16)
    bk_h = split_b(params["bk"]).astype(f32)
    wv_h = split_w(params["wv"]).astype(bf16)
    bv_h = split_b(params["bv"]).astype(f32)
    wo_h = params["wo"].reshape(H, Dh, D).astype(bf16)  # rows h*Dh:(h+1)*Dh of Wo
    w1 = params["w1"].astype(bf16)
    w2 = params["w2"].astype(bf16)

    def resident(shape):       # whole array, resident in VMEM across the grid
        ndim = len(shape)
        return pl.BlockSpec(shape, lambda b, qi, h: (0,) * ndim)

    kernel = functools.partial(encoder_layer_kernel, eps=eps)

    flops = int(8 * B * S * D * D + 4 * B * S * S * D + 4 * B * S * D * Dff)
    transcendentals = int(B * H * S * S + 6 * B * S)
    bytes_accessed = int(4 * B * S * D * 2 + 4 * B * S * S + 4 * B * H * S * S
                         + 2 * (4 * D * D + 2 * D * Dff))

    return pl.pallas_call(
        kernel,
        out_shape=(
            jax.ShapeDtypeStruct((B, S, D), f32),
            jax.ShapeDtypeStruct((B, H, S, S), f32),
        ),
        grid_spec=pltpu.PrefetchScalarGridSpec(
            num_scalar_prefetch=0,
            grid=(B, n_qt, H),
            in_specs=[
                pl.BlockSpec((1, S, D), lambda b, qi, h: (b, 0, 0)),     # x (K/V source)
                pl.BlockSpec((1, Tq, D), lambda b, qi, h: (b, qi, 0)),   # x (query tile)
                pl.BlockSpec((1, Tq, S), lambda b, qi, h: (b, qi, 0)),   # mask tile
                resident((H, D, Dh)), resident((H, 1, Dh)),              # Wq_h, bq_h
                resident((H, D, Dh)), resident((H, 1, Dh)),              # Wk_h, bk_h
                resident((H, D, Dh)), resident((H, 1, Dh)),              # Wv_h, bv_h
                resident((H, Dh, D)),                                    # Wo_h
                resident((1, D)),                                        # bo
                resident((1, D)), resident((1, D)),                      # gamma1, beta1
                resident((D, Dff)), resident((1, Dff)),                  # W1, b1
                resident((Dff, D)), resident((1, D)),                    # W2, b2
                resident((1, D)), resident((1, D)),                      # gamma2, beta2
            ],
            out_specs=[
                pl.BlockSpec((1, Tq, D), lambda b, qi, h: (b, qi, 0)),        # x_out
                pl.BlockSpec((1, 1, Tq, S), lambda b, qi, h: (b, h, qi, 0)),  # attn
            ],
            scratch_shapes=[pltpu.VMEM((Tq, D), jnp.float32)],               # head accumulator
        ),
        compiler_params=pltpu.CompilerParams(
            dimension_semantics=("parallel", "parallel", "arbitrary"),
            vmem_limit_bytes=48 * 1024 * 1024,
        ),
        cost_estimate=pl.CostEstimate(
            flops=flops,
            transcendentals=transcendentals,
            bytes_accessed=bytes_accessed,
        ),
    )(
        x, x, mask,
        wq_h, bq_h, wk_h, bk_h, wv_h, bv_h, wo_h, params["bo"],
        params["gamma1"], params["beta1"],
        w1, params["b1"], w2, params["b2"],
        params["gamma2"], params["beta2"],
    )


def init_params(key, d_model, d_ff):
    ks = jax.random.split(key, 8)
    sc = 0.02
    return {
        "wq": sc * jax.random.normal(ks[0], (d_model, d_model), jnp.float32),
        "bq": jnp.zeros((1, d_model), jnp.float32),
        "wk": sc * jax.random.normal(ks[1], (d_model, d_model), jnp.float32),
        "bk": jnp.zeros((1, d_model), jnp.float32),
        "wv": sc * jax.random.normal(ks[2], (d_model, d_model), jnp.float32),
        "bv": jnp.zeros((1, d_model), jnp.float32),
        "wo": sc * jax.random.normal(ks[3], (d_model, d_model), jnp.float32),
        "bo": jnp.zeros((1, d_model), jnp.float32),
        "gamma1": jnp.ones((1, d_model), jnp.float32),
        "beta1": jnp.zeros((1, d_model), jnp.float32),
        "w1": sc * jax.random.normal(ks[4], (d_model, d_ff), jnp.float32),
        "b1": jnp.zeros((1, d_ff), jnp.float32),
        "w2": sc * jax.random.normal(ks[5], (d_ff, d_model), jnp.float32),
        "b2": jnp.zeros((1, d_model), jnp.float32),
        "gamma2": jnp.ones((1, d_model), jnp.float32),
        "beta2": jnp.zeros((1, d_model), jnp.float32),
    }


def encoder_layer_reference(x, mask, p, *, num_heads, eps=1e-6):
    """Pure-JAX f32 reference of the PyTorch EncoderLayer forward (eval mode)."""
    B, S, D = x.shape
    H = num_heads
    Dh = D // H

    def ln(y, g, b):
        mu = jnp.mean(y, axis=-1, keepdims=True)
        var = jnp.mean((y - mu) ** 2, axis=-1, keepdims=True)
        return (y - mu) * jax.lax.rsqrt(var + eps) * g + b

    q = x @ p["wq"] + p["bq"]
    k = x @ p["wk"] + p["bk"]
    v = x @ p["wv"] + p["bv"]
    split = lambda t: t.reshape(B, S, H, Dh).transpose(0, 2, 1, 3)
    qh, kh, vh = split(q), split(k), split(v)
    scores = jnp.einsum("bhqd,bhkd->bhqk", qh, kh) / jnp.sqrt(jnp.float32(Dh))
    scores = jnp.where(mask[:, None, :, :] == 0.0, -1e9, scores)
    attn = jax.nn.softmax(scores, axis=-1)
    ctx = jnp.einsum("bhqk,bhkd->bhqd", attn, vh)
    ctx = ctx.transpose(0, 2, 1, 3).reshape(B, S, D)
    ctx = ctx @ p["wo"] + p["bo"]
    x1 = ln(x + ctx, p["gamma1"], p["beta1"])
    ffn = jnp.maximum(x1 @ p["w1"] + p["b1"], 0.0) @ p["w2"] + p["b2"]
    return ln(x1 + ffn, p["gamma2"], p["beta2"]), attn


if __name__ == "__main__":
    B, S, D, H, Dff = 2, 8, 32, 4, 64

    key = jax.random.PRNGKey(0)
    kx, kp = jax.random.split(key)
    x = jax.random.normal(kx, (B, S, D), jnp.float32)
    # padding-style mask: last two key positions of batch 1 are masked out
    mask = jnp.ones((B, S, S), jnp.float32)
    mask = mask.at[1, :, S - 2:].set(0.0)

    params = init_params(kp, D, Dff)

    out, attn = encoder_layer(x, mask, params, num_heads=H, eps=1e-6)
    jax.block_until_ready((out, attn))

    assert out.shape == (B, S, D)
    assert attn.shape == (B, H, S, S)
    assert bool(jnp.all(jnp.isfinite(out))) and bool(jnp.all(jnp.isfinite(attn)))

    # loose check vs f32 reference (kernel uses bf16 MXU inputs + approx recip)
    ref_out, ref_attn = encoder_layer_reference(x, mask, params, num_heads=H, eps=1e-6)
    assert float(jnp.max(jnp.abs(out - ref_out))) < 5e-2
    assert float(jnp.max(jnp.abs(attn - ref_attn))) < 5e-2

    print("KERNEL_OK")
</pallas_src>

<mosaic_0001>
module attributes {stable_mosaic.version = 11 : i64} {
  func.func @encoder_layer_kernel(%arg0: i32, %arg1: i32, %arg2: i32, %arg3: memref<1x8x32xf32, #tpu.memory_space<vmem>>, %arg4: memref<1x8x32xf32, #tpu.memory_space<vmem>>, %arg5: memref<1x8x8xf32, #tpu.memory_space<vmem>>, %arg6: memref<4x32x8xbf16, #tpu.memory_space<vmem>>, %arg7: memref<4x1x8xf32, #tpu.memory_space<vmem>>, %arg8: memref<4x32x8xbf16, #tpu.memory_space<vmem>>, %arg9: memref<4x1x8xf32, #tpu.memory_space<vmem>>, %arg10: memref<4x32x8xbf16, #tpu.memory_space<vmem>>, %arg11: memref<4x1x8xf32, #tpu.memory_space<vmem>>, %arg12: memref<4x8x32xbf16, #tpu.memory_space<vmem>>, %arg13: memref<1x32xf32, #tpu.memory_space<vmem>>, %arg14: memref<1x32xf32, #tpu.memory_space<vmem>>, %arg15: memref<1x32xf32, #tpu.memory_space<vmem>>, %arg16: memref<32x64xbf16, #tpu.memory_space<vmem>>, %arg17: memref<1x64xf32, #tpu.memory_space<vmem>>, %arg18: memref<64x32xbf16, #tpu.memory_space<vmem>>, %arg19: memref<1x32xf32, #tpu.memory_space<vmem>>, %arg20: memref<1x32xf32, #tpu.memory_space<vmem>>, %arg21: memref<1x32xf32, #tpu.memory_space<vmem>>, %arg22: memref<1x8x32xf32, #tpu.memory_space<vmem>>, %arg23: memref<1x1x8x8xf32, #tpu.memory_space<vmem>>, %arg24: memref<8x32xf32, #tpu.memory_space<vmem>>) attributes {dimension_semantics = [#tpu.dimension_semantics<parallel>, #tpu.dimension_semantics<parallel>, #tpu.dimension_semantics<arbitrary>], iteration_bounds = array<i64: 2, 1, 4>, scalar_prefetch = 0 : i64, scratch_operands = 1 : i64, tpu.core_type = #tpu.core_type<tc>, window_params = [{transform_indices = @transform_0, window_bounds = array<i64: 1, 8, 32>}, {transform_indices = @transform_1, window_bounds = array<i64: 1, 8, 32>}, {transform_indices = @transform_2, window_bounds = array<i64: 1, 8, 8>}, {pipeline_mode = #tpu.pipeline_mode<synchronous>, transform_indices = @transform_3, window_bounds = array<i64: 4, 32, 8>}, {pipeline_mode = #tpu.pipeline_mode<synchronous>, transform_indices = @transform_4, window_bounds = array<i64: 4, 1, 8>}, {pipeline_mode = #tpu.pipeline_mode<synchronous>, transform_indices = @transform_5, window_bounds = array<i64: 4, 32, 8>}, {pipeline_mode = #tpu.pipeline_mode<synchronous>, transform_indices = @transform_6, window_bounds = array<i64: 4, 1, 8>}, {pipeline_mode = #tpu.pipeline_mode<synchronous>, transform_indices = @transform_7, window_bounds = array<i64: 4, 32, 8>}, {pipeline_mode = #tpu.pipeline_mode<synchronous>, transform_indices = @transform_8, window_bounds = array<i64: 4, 1, 8>}, {pipeline_mode = #tpu.pipeline_mode<synchronous>, transform_indices = @transform_9, window_bounds = array<i64: 4, 8, 32>}, {pipeline_mode = #tpu.pipeline_mode<synchronous>, transform_indices = @transform_10, window_bounds = array<i64: 1, 32>}, {pipeline_mode = #tpu.pipeline_mode<synchronous>, transform_indices = @transform_11, window_bounds = array<i64: 1, 32>}, {pipeline_mode = #tpu.pipeline_mode<synchronous>, transform_indices = @transform_12, window_bounds = array<i64: 1, 32>}, {pipeline_mode = #tpu.pipeline_mode<synchronous>, transform_indices = @transform_13, window_bounds = array<i64: 32, 64>}, {pipeline_mode = #tpu.pipeline_mode<synchronous>, transform_indices = @transform_14, window_bounds = array<i64: 1, 64>}, {pipeline_mode = #tpu.pipeline_mode<synchronous>, transform_indices = @transform_15, window_bounds = array<i64: 64, 32>}, {pipeline_mode = #tpu.pipeline_mode<synchronous>, transform_indices = @transform_16, window_bounds = array<i64: 1, 32>}, {pipeline_mode = #tpu.pipeline_mode<synchronous>, transform_indices = @transform_17, window_bounds = array<i64: 1, 32>}, {pipeline_mode = #tpu.pipeline_mode<synchronous>, transform_indices = @transform_18, window_bounds = array<i64: 1, 32>}, {transform_indices = @transform_19, window_bounds = array<i64: 1, 8, 32>}, {transform_indices = @transform_20, window_bounds = array<i64: 1, 1, 8, 8>}]} {
    %c0 = arith.constant 0 : index
    %c0_0 = arith.constant 0 : index
    %c0_1 = arith.constant 0 : index
    %0 = vector.load %arg3[%c0, %c0_0, %c0_1] : memref<1x8x32xf32, #tpu.memory_space<vmem>>, vector<1x8x32xf32>
    %1 = vector.shape_cast %0 : vector<1x8x32xf32> to vector<8x32xf32>
    %c0_2 = arith.constant 0 : index
    %c0_3 = arith.constant 0 : index
    %c0_4 = arith.constant 0 : index
    %2 = vector.load %arg4[%c0_2, %c0_3, %c0_4] : memref<1x8x32xf32, #tpu.memory_space<vmem>>, vector<1x8x32xf32>
    %3 = vector.shape_cast %2 : vector<1x8x32xf32> to vector<8x32xf32>
    %4 = arith.truncf %1 : vector<8x32xf32> to vector<8x32xbf16>
    %5 = arith.truncf %3 : vector<8x32xf32> to vector<8x32xbf16>
    %6 = arith.index_cast %arg2 : i32 to index
    %c0_5 = arith.constant 0 : index
    %c0_6 = arith.constant 0 : index
    %7 = vector.load %arg6[%6, %c0_5, %c0_6] : memref<4x32x8xbf16, #tpu.memory_space<vmem>>, vector<1x32x8xbf16>
    %8 = vector.shape_cast %7 : vector<1x32x8xbf16> to vector<32x8xbf16>
    %cst = arith.constant dense<0.000000e+00> : vector<8x8xf32>
    %9 = tpu.matmul %5, %8, %cst {dimension_numbers = #tpu.dot_dimension_numbers<[1], [0], [0], [1], [0, 0, 1, 1], [], []>} : vector<8x32xbf16>, vector<32x8xbf16>, vector<8x8xf32> -> vector<8x8xf32>
    %10 = arith.index_cast %arg2 : i32 to index
    %c0_7 = arith.constant 0 : index
    %c0_8 = arith.constant 0 : index
    %11 = vector.load %arg7[%10, %c0_7, %c0_8] : memref<4x1x8xf32, #tpu.memory_space<vmem>>, vector<1x1x8xf32>
    %12 = vector.shape_cast %11 : vector<1x1x8xf32> to vector<1x8xf32>
    %13 = vector.broadcast %12 : vector<1x8xf32> to vector<8x8xf32>
    %14 = arith.addf %9, %13 : vector<8x8xf32>
    %15 = arith.index_cast %arg2 : i32 to index
    %c0_9 = arith.constant 0 : index
    %c0_10 = arith.constant 0 : index
    %16 = vector.load %arg8[%15, %c0_9, %c0_10] : memref<4x32x8xbf16, #tpu.memory_space<vmem>>, vector<1x32x8xbf16>
    %17 = vector.shape_cast %16 : vector<1x32x8xbf16> to vector<32x8xbf16>
    %cst_11 = arith.constant dense<0.000000e+00> : vector<8x8xf32>
    %18 = tpu.matmul %4, %17, %cst_11 {dimension_numbers = #tpu.dot_dimension_numbers<[1], [0], [0], [1], [0, 0, 1, 1], [], []>} : vector<8x32xbf16>, vector<32x8xbf16>, vector<8x8xf32> -> vector<8x8xf32>
    %19 = arith.index_cast %arg2 : i32 to index
    %c0_12 = arith.constant 0 : index
    %c0_13 = arith.constant 0 : index
    %20 = vector.load %arg9[%19, %c0_12, %c0_13] : memref<4x1x8xf32, #tpu.memory_space<vmem>>, vector<1x1x8xf32>
    %21 = vector.shape_cast %20 : vector<1x1x8xf32> to vector<1x8xf32>
    %22 = vector.broadcast %21 : vector<1x8xf32> to vector<8x8xf32>
    %23 = arith.addf %18, %22 : vector<8x8xf32>
    %24 = arith.index_cast %arg2 : i32 to index
    %c0_14 = arith.constant 0 : index
    %c0_15 = arith.constant 0 : index
    %25 = vector.load %arg10[%24, %c0_14, %c0_15] : memref<4x32x8xbf16, #tpu.memory_space<vmem>>, vector<1x32x8xbf16>
    %26 = vector.shape_cast %25 : vector<1x32x8xbf16> to vector<32x8xbf16>
    %cst_16 = arith.constant dense<0.000000e+00> : vector<8x8xf32>
    %27 = tpu.matmul %4, %26, %cst_16 {dimension_numbers = #tpu.dot_dimension_numbers<[1], [0], [0], [1], [0, 0, 1, 1], [], []>} : vector<8x32xbf16>, vector<32x8xbf16>, vector<8x8xf32> -> vector<8x8xf32>
    %28 = arith.index_cast %arg2 : i32 to index
    %c0_17 = arith.constant 0 : index
    %c0_18 = arith.constant 0 : index
    %29 = vector.load %arg11[%28, %c0_17, %c0_18] : memref<4x1x8xf32, #tpu.memory_space<vmem>>, vector<1x1x8xf32>
    %30 = vector.shape_cast %29 : vector<1x1x8xf32> to vector<1x8xf32>
    %31 = vector.broadcast %30 : vector<1x8xf32> to vector<8x8xf32>
    %32 = arith.addf %27, %31 : vector<8x8xf32>
    %33 = arith.truncf %14 : vector<8x8xf32> to vector<8x8xbf16>
    %34 = arith.truncf %23 : vector<8x8xf32> to vector<8x8xbf16>
    %cst_19 = arith.constant dense<0.000000e+00> : vector<8x8xf32>
    %35 = tpu.matmul %33, %34, %cst_19 {dimension_numbers = #tpu.dot_dimension_numbers<[1], [1], [0], [0], [0, 0, 1, 0], [], []>} : vector<8x8xbf16>, vector<8x8xbf16>, vector<8x8xf32> -> vector<8x8xf32>
    %c0_20 = arith.constant 0 : index
    %c0_21 = arith.constant 0 : index
    %c0_22 = arith.constant 0 : index
    %36 = vector.load %arg5[%c0_20, %c0_21, %c0_22] : memref<1x8x8xf32, #tpu.memory_space<vmem>>, vector<1x8x8xf32>
    %37 = vector.shape_cast %36 : vector<1x8x8xf32> to vector<8x8xf32>
    %cst_23 = arith.constant 0.000000e+00 : f32
    %38 = vector.broadcast %cst_23 : f32 to vector<8x8xf32>
    %39 = arith.cmpf oeq, %37, %38 : vector<8x8xf32>
    %cst_24 = arith.constant -1.000000e+09 : f32
    %40 = vector.broadcast %cst_24 : f32 to vector<8x8xf32>
    %41 = arith.select %39, %40, %35 : vector<8x8xi1>, vector<8x8xf32>
    %cst_25 = arith.constant dense<0xFF800000> : vector<8xf32>
    %42 = vector.multi_reduction <maximumf>, %41, %cst_25 [1] : vector<8x8xf32> to vector<8xf32>
    %43 = vector.shape_cast %42 : vector<8xf32> to vector<8x1xf32>
    %44 = vector.broadcast %43 : vector<8x1xf32> to vector<8x8xf32>
    %45 = arith.subf %41, %44 : vector<8x8xf32>
    %46 = math.exp %45 : vector<8x8xf32>
    %cst_26 = arith.constant dense<0.000000e+00> : vector<8xf32>
    %47 = vector.multi_reduction <add>, %46, %cst_26 [1] : vector<8x8xf32> to vector<8xf32>
    %48 = vector.shape_cast %47 : vector<8xf32> to vector<8x1xf32>
    %49 = tpu.reciprocal %48 {approx = true} : vector<8x1xf32> -> vector<8x1xf32>
    %50 = vector.broadcast %49 : vector<8x1xf32> to vector<8x8xf32>
    %51 = arith.mulf %46, %50 : vector<8x8xf32>
    %c0_27 = arith.constant 0 : index
    %c0_28 = arith.constant 0 : index
    %c0_29 = arith.constant 0 : index
    %c0_30 = arith.constant 0 : index
    %52 = vector.load %arg23[%c0_27, %c0_28, %c0_29, %c0_30] : memref<1x1x8x8xf32, #tpu.memory_space<vmem>>, vector<1x1x8x8xf32>
    %53 = vector.shape_cast %52 : vector<1x1x8x8xf32> to vector<8x8xf32>
    %54 = vector.shape_cast %51 : vector<8x8xf32> to vector<1x1x8x8xf32>
    tpu.vector_store %arg23[%c0_27, %c0_28, %c0_29, %c0_30], %54 {strides = array<i32>} : memref<1x1x8x8xf32, #tpu.memory_space<vmem>>, vector<1x1x8x8xf32>,
    %55 = arith.truncf %51 : vector<8x8xf32> to vector<8x8xbf16>
    %56 = arith.truncf %32 : vector<8x8xf32> to vector<8x8xbf16>
    %cst_31 = arith.constant dense<0.000000e+00> : vector<8x8xf32>
    %57 = tpu.matmul %55, %56, %cst_31 {dimension_numbers = #tpu.dot_dimension_numbers<[1], [0], [0], [1], [0, 0, 1, 1], [], []>} : vector<8x8xbf16>, vector<8x8xbf16>, vector<8x8xf32> -> vector<8x8xf32>
    %58 = arith.truncf %57 : vector<8x8xf32> to vector<8x8xbf16>
    %59 = arith.index_cast %arg2 : i32 to index
    %c0_32 = arith.constant 0 : index
    %c0_33 = arith.constant 0 : index
    %60 = vector.load %arg12[%59, %c0_32, %c0_33] : memref<4x8x32xbf16, #tpu.memory_space<vmem>>, vector<1x8x32xbf16>
    %61 = vector.shape_cast %60 : vector<1x8x32xbf16> to vector<8x32xbf16>
    %cst_34 = arith.constant dense<0.000000e+00> : vector<8x32xf32>
    %62 = tpu.matmul %58, %61, %cst_34 {dimension_numbers = #tpu.dot_dimension_numbers<[1], [0], [0], [1], [0, 0, 1, 1], [], []>} : vector<8x8xbf16>, vector<8x32xbf16>, vector<8x32xf32> -> vector<8x32xf32>
    %c0_i32 = arith.constant 0 : i32
    %63 = arith.cmpi eq, %arg2, %c0_i32 : i32
    %64 = arith.extui %63 : i1 to i32
    %c0_i32_35 = arith.constant 0 : i32
    %65 = arith.cmpi ne, %64, %c0_i32_35 : i32
    scf.if %65 {
      %c0_41 = arith.constant 0 : index
      %c0_42 = arith.constant 0 : index
      %72 = vector.load %arg13[%c0_41, %c0_42] : memref<1x32xf32, #tpu.memory_space<vmem>>, vector<1x32xf32>
      %73 = vector.shape_cast %72 : vector<1x32xf32> to vector<1x32xf32>
      %74 = vector.broadcast %73 : vector<1x32xf32> to vector<8x32xf32>
      %c0_43 = arith.constant 0 : index
      %c0_44 = arith.constant 0 : index
      %75 = vector.load %arg24[%c0_43, %c0_44] : memref<8x32xf32, #tpu.memory_space<vmem>>, vector<8x32xf32>
      tpu.vector_store %arg24[%c0_43, %c0_44], %74 {strides = array<i32>} : memref<8x32xf32, #tpu.memory_space<vmem>>, vector<8x32xf32>,
    } else {
    }
    %c0_36 = arith.constant 0 : index
    %c0_37 = arith.constant 0 : index
    %66 = vector.load %arg24[%c0_36, %c0_37] : memref<8x32xf32, #tpu.memory_space<vmem>>, vector<8x32xf32>
    %67 = arith.addf %66, %62 : vector<8x32xf32>
    %c0_38 = arith.constant 0 : index
    %c0_39 = arith.constant 0 : index
    %68 = vector.load %arg24[%c0_38, %c0_39] : memref<8x32xf32, #tpu.memory_space<vmem>>, vector<8x32xf32>
    tpu.vector_store %arg24[%c0_38, %c0_39], %67 {strides = array<i32>} : memref<8x32xf32, #tpu.memory_space<vmem>>, vector<8x32xf32>,
    %c3_i32 = arith.constant 3 : i32
    %69 = arith.cmpi eq, %arg2, %c3_i32 : i32
    %70 = arith.extui %69 : i1 to i32
    %c0_i32_40 = arith.constant 0 : i32
    %71 = arith.cmpi ne, %70, %c0_i32_40 : i32
    scf.if %71 {
      %c0_41 = arith.constant 0 : index
      %c0_42 = arith.constant 0 : index
      %72 = vector.load %arg24[%c0_41, %c0_42] : memref<8x32xf32, #tpu.memory_space<vmem>>, vector<8x32xf32>
      %73 = arith.addf %3, %72 : vector<8x32xf32>
      %c0_43 = arith.constant 0 : index
      %c0_44 = arith.constant 0 : index
      %74 = vector.load %arg14[%c0_43, %c0_44] : memref<1x32xf32, #tpu.memory_space<vmem>>, vector<1x32xf32>
      %c0_45 = arith.constant 0 : index
      %c0_46 = arith.constant 0 : index
      %75 = vector.load %arg15[%c0_45, %c0_46] : memref<1x32xf32, #tpu.memory_space<vmem>>, vector<1x32xf32>
      %cst_47 = arith.constant dense<0.000000e+00> : vector<8xf32>
      %76 = vector.multi_reduction <add>, %73, %cst_47 [1] : vector<8x32xf32> to vector<8xf32>
      %77 = vector.shape_cast %76 : vector<8xf32> to vector<8x1xf32>
      %cst_48 = arith.constant 3.200000e+01 : f32
      %78 = vector.broadcast %cst_48 : f32 to vector<8x1xf32>
      %79 = arith.divf %77, %78 : vector<8x1xf32>
      %80 = arith.mulf %73, %73 : vector<8x32xf32>
      %cst_49 = arith.constant dense<0.000000e+00> : vector<8xf32>
      %81 = vector.multi_reduction <add>, %80, %cst_49 [1] : vector<8x32xf32> to vector<8xf32>
      %82 = vector.shape_cast %81 : vector<8xf32> to vector<8x1xf32>
      %cst_50 = arith.constant 3.200000e+01 : f32
      %83 = vector.broadcast %cst_50 : f32 to vector<8x1xf32>
      %84 = arith.divf %82, %83 : vector<8x1xf32>
      %85 = arith.mulf %79, %79 : vector<8x1xf32>
      %86 = arith.subf %84, %85 : vector<8x1xf32>
      %cst_51 = arith.constant 0.000000e+00 : f32
      %87 = vector.broadcast %cst_51 : f32 to vector<8x1xf32>
      %88 = arith.maximumf %86, %87 : vector<8x1xf32>
      %89 = vector.broadcast %79 : vector<8x1xf32> to vector<8x32xf32>
      %90 = arith.subf %73, %89 : vector<8x32xf32>
      %cst_52 = arith.constant 9.99999997E-7 : f32
      %91 = vector.broadcast %cst_52 : f32 to vector<8x1xf32>
      %92 = arith.addf %88, %91 : vector<8x1xf32>
      %93 = math.rsqrt %92 : vector<8x1xf32>
      %94 = vector.broadcast %93 : vector<8x1xf32> to vector<8x32xf32>
      %95 = arith.mulf %90, %94 : vector<8x32xf32>
      %96 = vector.broadcast %74 : vector<1x32xf32> to vector<8x32xf32>
      %97 = arith.mulf %95, %96 : vector<8x32xf32>
      %98 = vector.broadcast %75 : vector<1x32xf32> to vector<8x32xf32>
      %99 = arith.addf %97, %98 : vector<8x32xf32>
      %100 = arith.truncf %99 : vector<8x32xf32> to vector<8x32xbf16>
      %c0_53 = arith.constant 0 : index
      %c0_54 = arith.constant 0 : index
      %101 = vector.load %arg16[%c0_53, %c0_54] : memref<32x64xbf16, #tpu.memory_space<vmem>>, vector<32x64xbf16>
      %cst_55 = arith.constant dense<0.000000e+00> : vector<8x64xf32>
      %102 = tpu.matmul %100, %101, %cst_55 {dimension_numbers = #tpu.dot_dimension_numbers<[1], [0], [0], [1], [0, 0, 1, 1], [], []>} : vector<8x32xbf16>, vector<32x64xbf16>, vector<8x64xf32> -> vector<8x64xf32>
      %c0_56 = arith.constant 0 : index
      %c0_57 = arith.constant 0 : index
      %103 = vector.load %arg17[%c0_56, %c0_57] : memref<1x64xf32, #tpu.memory_space<vmem>>, vector<1x64xf32>
      %104 = vector.broadcast %103 : vector<1x64xf32> to vector<8x64xf32>
      %105 = arith.addf %102, %104 : vector<8x64xf32>
      %cst_58 = arith.constant 0.000000e+00 : f32
      %106 = vector.broadcast %cst_58 : f32 to vector<8x64xf32>
      %107 = arith.maximumf %105, %106 : vector<8x64xf32>
      %108 = arith.truncf %107 : vector<8x64xf32> to vector<8x64xbf16>
      %c0_59 = arith.constant 0 : index
      %c0_60 = arith.constant 0 : index
      %109 = vector.load %arg18[%c0_59, %c0_60] : memref<64x32xbf16, #tpu.memory_space<vmem>>, vector<64x32xbf16>
      %cst_61 = arith.constant dense<0.000000e+00> : vector<8x32xf32>
      %110 = tpu.matmul %108, %109, %cst_61 {dimension_numbers = #tpu.dot_dimension_numbers<[1], [0], [0], [1], [0, 0, 1, 1], [], []>} : vector<8x64xbf16>, vector<64x32xbf16>, vector<8x32xf32> -> vector<8x32xf32>
      %c0_62 = arith.constant 0 : index
      %c0_63 = arith.constant 0 : index
      %111 = vector.load %arg19[%c0_62, %c0_63] : memref<1x32xf32, #tpu.memory_space<vmem>>, vector<1x32xf32>
      %112 = vector.broadcast %111 : vector<1x32xf32> to vector<8x32xf32>
      %113 = arith.addf %110, %112 : vector<8x32xf32>
      %114 = arith.addf %99, %113 : vector<8x32xf32>
      %c0_64 = arith.constant 0 : index
      %c0_65 = arith.constant 0 : index
      %115 = vector.load %arg20[%c0_64, %c0_65] : memref<1x32xf32, #tpu.memory_space<vmem>>, vector<1x32xf32>
      %c0_66 = arith.constant 0 : index
      %c0_67 = arith.constant 0 : index
      %116 = vector.load %arg21[%c0_66, %c0_67] : memref<1x32xf32, #tpu.memory_space<vmem>>, vector<1x32xf32>
      %cst_68 = arith.constant dense<0.000000e+00> : vector<8xf32>
      %117 = vector.multi_reduction <add>, %114, %cst_68 [1] : vector<8x32xf32> to vector<8xf32>
      %118 = vector.shape_cast %117 : vector<8xf32> to vector<8x1xf32>
      %cst_69 = arith.constant 3.200000e+01 : f32
      %119 = vector.broadcast %cst_69 : f32 to vector<8x1xf32>
      %120 = arith.divf %118, %119 : vector<8x1xf32>
      %121 = arith.mulf %114, %114 : vector<8x32xf32>
      %cst_70 = arith.constant dense<0.000000e+00> : vector<8xf32>
      %122 = vector.multi_reduction <add>, %121, %cst_70 [1] : vector<8x32xf32> to vector<8xf32>
      %123 = vector.shape_cast %122 : vector<8xf32> to vector<8x1xf32>
      %cst_71 = arith.constant 3.200000e+01 : f32
      %124 = vector.broadcast %cst_71 : f32 to vector<8x1xf32>
      %125 = arith.divf %123, %124 : vector<8x1xf32>
      %126 = arith.mulf %120, %120 : vector<8x1xf32>
      %127 = arith.subf %125, %126 : vector<8x1xf32>
      %cst_72 = arith.constant 0.000000e+00 : f32
      %128 = vector.broadcast %cst_72 : f32 to vector<8x1xf32>
      %129 = arith.maximumf %127, %128 : vector<8x1xf32>
      %130 = vector.broadcast %120 : vector<8x1xf32> to vector<8x32xf32>
      %131 = arith.subf %114, %130 : vector<8x32xf32>
      %cst_73 = arith.constant 9.99999997E-7 : f32
      %132 = vector.broadcast %cst_73 : f32 to vector<8x1xf32>
      %133 = arith.addf %129, %132 : vector<8x1xf32>
      %134 = math.rsqrt %133 : vector<8x1xf32>
      %135 = vector.broadcast %134 : vector<8x1xf32> to vector<8x32xf32>
      %136 = arith.mulf %131, %135 : vector<8x32xf32>
      %137 = vector.broadcast %115 : vector<1x32xf32> to vector<8x32xf32>
      %138 = arith.mulf %136, %137 : vector<8x32xf32>
      %139 = vector.broadcast %116 : vector<1x32xf32> to vector<8x32xf32>
      %140 = arith.addf %138, %139 : vector<8x32xf32>
      %c0_74 = arith.constant 0 : index
      %c0_75 = arith.constant 0 : index
      %c0_76 = arith.constant 0 : index
      %141 = vector.load %arg22[%c0_74, %c0_75, %c0_76] : memref<1x8x32xf32, #tpu.memory_space<vmem>>, vector<1x8x32xf32>
      %142 = vector.shape_cast %141 : vector<1x8x32xf32> to vector<8x32xf32>
      %143 = vector.shape_cast %140 : vector<8x32xf32> to vector<1x8x32xf32>
      tpu.vector_store %arg22[%c0_74, %c0_75, %c0_76], %143 {strides = array<i32>} : memref<1x8x32xf32, #tpu.memory_space<vmem>>, vector<1x8x32xf32>,
    } else {
    }
    return
  }
  func.func @transform_0(%arg0: i32, %arg1: i32, %arg2: i32) -> (i32, i32, i32) {
    %c0_i32 = arith.constant 0 : i32
    %c0_i32_0 = arith.constant 0 : i32
    %c0_i32_1 = arith.constant 0 : i32
    return %arg0, %c0_i32, %c0_i32_0 : i32, i32, i32
  }
  func.func @transform_1(%arg0: i32, %arg1: i32, %arg2: i32) -> (i32, i32, i32) {
    %c0_i32 = arith.constant 0 : i32
    %c0_i32_0 = arith.constant 0 : i32
    return %arg0, %arg1, %c0_i32 : i32, i32, i32
  }
  func.func @transform_2(%arg0: i32, %arg1: i32, %arg2: i32) -> (i32, i32, i32) {
    %c0_i32 = arith.constant 0 : i32
    %c0_i32_0 = arith.constant 0 : i32
    return %arg0, %arg1, %c0_i32 : i32, i32, i32
  }
  func.func @transform_3(%arg0: i32, %arg1: i32, %arg2: i32) -> (i32, i32, i32) {
    %c0_i32 = arith.constant 0 : i32
    %c0_i32_0 = arith.constant 0 : i32
    %c0_i32_1 = arith.constant 0 : i32
    %c0_i32_2 = arith.constant 0 : i32
    return %c0_i32, %c0_i32_0, %c0_i32_1 : i32, i32, i32
  }
  func.func @transform_4(%arg0: i32, %arg1: i32, %arg2: i32) -> (i32, i32, i32) {
    %c0_i32 = arith.constant 0 : i32
    %c0_i32_0 = arith.constant 0 : i32
    %c0_i32_1 = arith.constant 0 : i32
    %c0_i32_2 = arith.constant 0 : i32
    return %c0_i32, %c0_i32_0, %c0_i32_1 : i32, i32, i32
  }
  func.func @transform_5(%arg0: i32, %arg1: i32, %arg2: i32) -> (i32, i32, i32) {
    %c0_i32 = arith.constant 0 : i32
    %c0_i32_0 = arith.constant 0 : i32
    %c0_i32_1 = arith.constant 0 : i32
    %c0_i32_2 = arith.constant 0 : i32
    return %c0_i32, %c0_i32_0, %c0_i32_1 : i32, i32, i32
  }
  func.func @transform_6(%arg0: i32, %arg1: i32, %arg2: i32) -> (i32, i32, i32) {
    %c0_i32 = arith.constant 0 : i32
    %c0_i32_0 = arith.constant 0 : i32
    %c0_i32_1 = arith.constant 0 : i32
    %c0_i32_2 = arith.constant 0 : i32
    return %c0_i32, %c0_i32_0, %c0_i32_1 : i32, i32, i32
  }
  func.func @transform_7(%arg0: i32, %arg1: i32, %arg2: i32) -> (i32, i32, i32) {
    %c0_i32 = arith.constant 0 : i32
    %c0_i32_0 = arith.constant 0 : i32
    %c0_i32_1 = arith.constant 0 : i32
    %c0_i32_2 = arith.constant 0 : i32
    return %c0_i32, %c0_i32_0, %c0_i32_1 : i32, i32, i32
  }
  func.func @transform_8(%arg0: i32, %arg1: i32, %arg2: i32) -> (i32, i32, i32) {
    %c0_i32 = arith.constant 0 : i32
    %c0_i32_0 = arith.constant 0 : i32
    %c0_i32_1 = arith.constant 0 : i32
    %c0_i32_2 = arith.constant 0 : i32
    return %c0_i32, %c0_i32_0, %c0_i32_1 : i32, i32, i32
  }
  func.func @transform_9(%arg0: i32, %arg1: i32, %arg2: i32) -> (i32, i32, i32) {
    %c0_i32 = arith.constant 0 : i32
    %c0_i32_0 = arith.constant 0 : i32
    %c0_i32_1 = arith.constant 0 : i32
    %c0_i32_2 = arith.constant 0 : i32
    return %c0_i32, %c0_i32_0, %c0_i32_1 : i32, i32, i32
  }
  func.func @transform_10(%arg0: i32, %arg1: i32, %arg2: i32) -> (i32, i32) {
    %c0_i32 = arith.constant 0 : i32
    %c0_i32_0 = arith.constant 0 : i32
    %c0_i32_1 = arith.constant 0 : i32
    return %c0_i32, %c0_i32_0 : i32, i32
  }
  func.func @transform_11(%arg0: i32, %arg1: i32, %arg2: i32) -> (i32, i32) {
    %c0_i32 = arith.constant 0 : i32
    %c0_i32_0 = arith.constant 0 : i32
    %c0_i32_1 = arith.constant 0 : i32
    return %c0_i32, %c0_i32_0 : i32, i32
  }
  func.func @transform_12(%arg0: i32, %arg1: i32, %arg2: i32) -> (i32, i32) {
    %c0_i32 = arith.constant 0 : i32
    %c0_i32_0 = arith.constant 0 : i32
    %c0_i32_1 = arith.constant 0 : i32
    return %c0_i32, %c0_i32_0 : i32, i32
  }
  func.func @transform_13(%arg0: i32, %arg1: i32, %arg2: i32) -> (i32, i32) {
    %c0_i32 = arith.constant 0 : i32
    %c0_i32_0 = arith.constant 0 : i32
    %c0_i32_1 = arith.constant 0 : i32
    return %c0_i32, %c0_i32_0 : i32, i32
  }
  func.func @transform_14(%arg0: i32, %arg1: i32, %arg2: i32) -> (i32, i32) {
    %c0_i32 = arith.constant 0 : i32
    %c0_i32_0 = arith.constant 0 : i32
    %c0_i32_1 = arith.constant 0 : i32
    return %c0_i32, %c0_i32_0 : i32, i32
  }
  func.func @transform_15(%arg0: i32, %arg1: i32, %arg2: i32) -> (i32, i32) {
    %c0_i32 = arith.constant 0 : i32
    %c0_i32_0 = arith.constant 0 : i32
    %c0_i32_1 = arith.constant 0 : i32
    return %c0_i32, %c0_i32_0 : i32, i32
  }
  func.func @transform_16(%arg0: i32, %arg1: i32, %arg2: i32) -> (i32, i32) {
    %c0_i32 = arith.constant 0 : i32
    %c0_i32_0 = arith.constant 0 : i32
    %c0_i32_1 = arith.constant 0 : i32
    return %c0_i32, %c0_i32_0 : i32, i32
  }
  func.func @transform_17(%arg0: i32, %arg1: i32, %arg2: i32) -> (i32, i32) {
    %c0_i32 = arith.constant 0 : i32
    %c0_i32_0 = arith.constant 0 : i32
    %c0_i32_1 = arith.constant 0 : i32
    return %c0_i32, %c0_i32_0 : i32, i32
  }
  func.func @transform_18(%arg0: i32, %arg1: i32, %arg2: i32) -> (i32, i32) {
    %c0_i32 = arith.constant 0 : i32
    %c0_i32_0 = arith.constant 0 : i32
    %c0_i32_1 = arith.constant 0 : i32
    return %c0_i32, %c0_i32_0 : i32, i32
  }
  func.func @transform_19(%arg0: i32, %arg1: i32, %arg2: i32) -> (i32, i32, i32) {
    %c0_i32 = arith.constant 0 : i32
    %c0_i32_0 = arith.constant 0 : i32
    return %arg0, %arg1, %c0_i32 : i32, i32, i32
  }
  func.func @transform_20(%arg0: i32, %arg1: i32, %arg2: i32) -> (i32, i32, i32, i32) {
    %c0_i32 = arith.constant 0 : i32
    %c0_i32_0 = arith.constant 0 : i32
    return %arg0, %arg2, %arg1, %c0_i32 : i32, i32, i32, i32
  }
}

</mosaic_0001>

<bundles_post_ra>
// kernel: tpu_custom_call.1
= control target key start
LH: loop header
LB: loop body
LE: loop exit
PB: predicated region body
PF: predicated region fallthrough
CT: control target
= control target key end

     0   :  { %s2390_s0 = inlined_call_operand.vmem [shape: f32[2,8,32], index: 0, kind: input, shape index: {}]   ;;  %s2391_s1 = inlined_call_operand.vmem [shape: f32[2,8,32], index: 1, kind: input, shape index: {}]   ;;  %s2392_s2 = inlined_call_operand.vmem [shape: f32[2,8,8], index: 2, kind: input, shape index: {}]   ;;  %s2393_s3 = inlined_call_operand.vmem [shape: bf16[4,32,8], index: 3, kind: input, shape index: {}]   ;;  %s2394_s4 = inlined_call_operand.vmem [shape: f32[4,1,8], index: 4, kind: input, shape index: {}]   ;;  %s2395_s5 = inlined_call_operand.vmem [shape: bf16[4,32,8], index: 5, kind: input, shape index: {}]   ;;  %s2396_s6 = inlined_call_operand.vmem [shape: f32[4,1,8], index: 6, kind: input, shape index: {}]   ;;  %s2397_s7 = inlined_call_operand.vmem [shape: bf16[4,32,8], index: 7, kind: input, shape index: {}]   ;;  %s2398_s8 = inlined_call_operand.vmem [shape: f32[4,1,8], index: 8, kind: input, shape index: {}]   ;;  %s2399_s9 = inlined_call_operand.vmem [shape: bf16[4,8,32], index: 9, kind: input, shape index: {}]   ;;  %s2400_s10 = inlined_call_operand.vmem [shape: f32[1,32], index: 10, kind: input, shape index: {}]   ;;  %s2401_s11 = inlined_call_operand.vmem [shape: f32[1,32], index: 11, kind: input, shape index: {}]   ;;  %s2402_s12 = inlined_call_operand.vmem [shape: f32[1,32], index: 12, kind: input, shape index: {}]   ;;  %s2403_s13 = inlined_call_operand.vmem [shape: bf16[32,64], index: 13, kind: input, shape index: {}]   ;;  %s2404_s14 = inlined_call_operand.vmem [shape: f32[1,64], index: 14, kind: input, shape index: {}]   ;;  %s2405_s15 = inlined_call_operand.vmem [shape: bf16[64,32], index: 15, kind: input, shape index: {}]   ;;  %s2406_s16 = inlined_call_operand.vmem [shape: f32[1,32], index: 16, kind: input, shape index: {}]   ;;  %s2407_s17 = inlined_call_operand.vmem [shape: f32[1,32], index: 17, kind: input, shape index: {}]   ;;  %s2408_s18 = inlined_call_operand.vmem [shape: f32[1,32], index: 18, kind: input, shape index: {}]   ;;  %s2409_s19 = inlined_call_operand.hbm [shape: f32[2,8,32], index: 19, kind: output, shape index: {0}]   ;;  %s2410_s20 = inlined_call_operand.hbm [shape: f32[2,4,8,8], index: 20, kind: output, shape index: {1}]  }
   0x1   :  { %2424 = sst [smem:[#allocation17_spill]] %s2390_s0 }
   0x2   :  { %2425 = sst [smem:[#allocation18_spill]] %s2391_s1 }
   0x3   :  { %2426 = sst [smem:[#allocation19_spill]] %s2392_s2 }
   0x4   :  { %2427 = sst [smem:[#allocation20_spill]] %s2393_s3 }
   0x5   :  { %2428 = sst [smem:[#allocation21_spill]] %s2394_s4 }
   0x6   :  { %2429 = sst [smem:[#allocation22_spill]] %s2395_s5 }
   0x7   :  { %2430 = sst [smem:[#allocation23_spill]] %s2396_s6 }
   0x8   :  { %2431 = sst [smem:[#allocation24_spill]] %s2397_s7 }
   0x9   :  { %2432 = sst [smem:[#allocation25_spill]] %s2398_s8 }
   0xa   :  { %2433 = sst [smem:[#allocation26_spill]] %s2399_s9 }
   0xb   :  { %2434 = sst [smem:[#allocation27_spill]] %s2400_s10 }
   0xc   :  { %2435 = sst [smem:[#allocation28_spill]] %s2401_s11 }
   0xd   :  { %2436 = sst [smem:[#allocation29_spill]] %s2402_s12 }
   0xe   :  { %2437 = sst [smem:[#allocation30_spill]] %s2403_s13 }
   0xf   :  { %2438 = sst [smem:[#allocation31_spill]] %s2404_s14 }
  0x10   :  { %2439 = sst [smem:[#allocation32_spill]] %s2406_s16 }
  0x11   :  { %2440 = sst [smem:[#allocation33_spill]] %s2407_s17 }
  0x12   :  { %2441 = sst [smem:[#allocation34_spill]] %s2408_s18 }
  0x13   :  { %2442 = sst [smem:[#allocation35_spill]] %s2409_s19 }
  0x14   :  { %2443 = sst [smem:[#allocation36_spill]] %s2410_s20 }
  0x15   :  { %26 = vsyncpa [#allocation4], 0 }
  0x16   :  { %28 = vsyncpa [#allocation4 + $0x1], 0 }
  0x17   :  { %29 = vsyncpa [#allocation6], 0 }
  0x18   :  { %31 = vsyncpa [#allocation6 + $0x1], 0  ;;  %s2042_s1 = smov 0   ;;  %s2044_s22 = smov 0  }
  0x19   :  { %s2046_s23 = smov 0   ;;  %s2048_s24 = smov 0  }
  0x1a   :  { %s2050_s2 = smov 0   ;;  %s2052_s25 = smov 0  }
  0x1b   :  { %s2054_s3 = smov 0   ;;  %s2056_s26 = smov 0  }
  0x1c   :  { %s2058_s27 = smov 0   ;;  %s2060_s28 = smov 0  }
  0x1d   :  { %s2062_s4 = smov 0  }
  0x1e LB: > { %2444 = sst [smem:[#allocation9_spill]] %s1901_s24  ;;  %s1517_s29 = sadd.s32 4294967295, %s1929_s4   ;;  %s1929_s4 = sphi %s2062_s4, %s37_s4   ;;  %s1925_s28 = sphi %s2060_s28, %s2490_s28   ;;  %s1921_s27 = sphi %s2058_s27, %s2496_s27   ;;  %s1917_s26 = sphi %s2056_s26, %s2488_s26   ;;  %s1913_s3 = sphi %s2054_s3, %s2487_s3   ;;  %s1909_s25 = sphi %s2052_s25, %s2486_s25   ;;  %s1905_s2 = sphi %s2050_s2, %s2495_s2   ;;  %s1901_s24 = sphi %s2048_s24, %s2494_s24   ;;  %s1897_s23 = sphi %s2046_s23, %s2493_s23   ;;  %s1893_s22 = sphi %s2044_s22, %s2492_s22   ;;  %s1889_s1 = sphi %s2042_s1, %s2491_s1  }
  0x1f   : > { %2445 = sst [smem:[#allocation10_spill]] %s1909_s25  ;;  %s1518_s30 = sadd.s32 4294967294, %s1929_s4  }
  0x20   : > { %2446 = sst [smem:[#allocation11_spill]] %s1921_s27  ;;  %s49_s0 = sadd.s32 1, %s1921_s27 }
  0x21   : > { %2447 = sst [smem:[#allocation12_spill]] %s1925_s28  ;;  %s56_s21 = sadd.s32 1, %s1925_s28 }
  0x22   : > { %p50_p0 = scmp.ge.s32.totalorder %s49_s0, 4  ;;  %s483_s20 = sadd.s32 1, %s1909_s25 }
  0x23   : > { %p493_p1 = scmp.ne.s32.totalorder %s1909_s25, %s1905_s2  ;;  %p2104_p2 = scmp.eq.s32.totalorder %s1517_s29, 7 }
  0x24   : > { %s2498_s0 = smov (%p50_p0, %s49_s0), 0  ;;  %s2500_s21 = smov (!%p50_p0, %s56_s21), %s1925_s28 }
  0x25   : > { %2449 = sst [smem:[#allocation13_spill]] %s2498_s0  ;;  %p2113_p3 = por %p2104_p2, %p493_p1 }
  0x26   : > { %p499_p4 = scmp.ne.s32.totalorder %s1905_s2, %s1901_s24  ;;  %p58_p5 = scmp.ge.s32.totalorder %s2500_s21, 2 }
  0x27   : > { %s2450_s18 = scalar_select %p2113_p3, 1, 0 }
  0x28   : > { %p2119_p6 = scmp.eq.s32.totalorder %s1518_s30, 7  ;;  %s507_s17 = ssub.s32 %s1921_s27, %s2498_s0 }
  0x29   : > { %2451 = sst [smem:[#allocation14_spill]] %s2450_s18  ;;  %s513_s16 = sadd.s32 1, %s1897_s23 }
  0x2a   : > { %s2502_s21 = smov (%p58_p5, %s2500_s21), 0  ;;  %p2130_p7 = por %p2119_p6, %p499_p4 }
  0x2b   : > { %2453 = sst [smem:[#allocation15_spill]] %s2502_s21  ;;  %p523_p8 = scmp.ne.s32.totalorder %s1897_s23, %s1893_s22 }
  0x2c   : > { %s2454_s14 = scalar_select %p2130_p7, 1, 0 }
  0x2d   : > { %s478_s24 = ssub.s32 %s1925_s28, %s2502_s21  ;;  %p529_p9 = scmp.ne.s32.totalorder %s1893_s22, %s1889_s1 }
  0x2e   : > { %p481_p10 = scmp.eq.s32.totalorder %s478_s24, 0  ;;  %s508_s30 = sor.u32 %s507_s17, %s478_s24 }
  0x2f   : > { %p511_p11 = scmp.eq.s32.totalorder %s508_s30, 0  ;;  %p2142_p12 = por %p523_p8, %p2104_p2 }
  0x30   : > { %s2147_s0 = scalar_select %p481_p10, %s1909_s25, %s483_s20  }
  0x31   : > { %s2150_s27 = scalar_select %p511_p11, %s1897_s23, %s513_s16  }
  0x32   : > { %2456 = sst [smem:[#allocation16_spill]] %s2147_s0  ;;  %p2154_p13 = por %p529_p9, %p2119_p6 }
  0x33   : > { %p1521_p0 = scmp.ge.s32.totalorder %s1929_s4, 1  ;;  %p623_p1 = scmp.lt.s32.totalorder %s1929_s4, 9 }
  0x34   : > { %s2457_s12 = scalar_select %p2154_p13, 1, 0 }
  0x35   : > { %p624_p4 = pnand %p1521_p0, %p623_p1 }
  0x36   : > { %s1571_s17 = sshll.u32 (!%p624_p4), %s1913_s3, 4  ;;  %s2420_s19 = sand.u32 (!%p624_p4), 1, %s1905_s2  }
  0x37   : > { %627 = sbr.rel (%p624_p4) target bundleno = 1992 (0x7c8), region = 96  ;;  %s2458_s5 = sld [smem:[#allocation22_spill]] (!%p624_p4) }
  0x38   : > { %s2169_s29 = sshll.u32 (!%p624_p4), %s2420_s19, 3  ;;  %s2459_s28 = sld [smem:[#allocation20_spill]] (!%p624_p4) }
  0x39   : > { %p699_p2 = scmp.lt.s32.totalorder (!%p624_p4), %s1917_s26, 1  ;;  %s2460_s7 = sld [smem:[#allocation24_spill]] (!%p624_p4) }
  0x3a   : > { %s2463_s6 = sld [smem:[#allocation23_spill]] (!%p624_p4)  ;;  %p1547_p5 = scmp.ne.s32.totalorder (!%p624_p4), %s1913_s3, 0 }
  0x3b   : > { %s2465_s20 = sld [smem:[#allocation19_spill]] (!%p624_p4) }
  0x3c   : > { %v1931_v0 = vmov 0.0   ;;  %vm1932_vm0 = vmmov 0   ;;  %vm749_vm1 = vcmask 261120   ;;  %vm930_vm2 = vcmask 64512   ;;  %s2466_s8 = sld [smem:[#allocation25_spill]] }
  0x3d   : > { %1605 = vmatprep.subr.bf16.mxu1 %v1931_v0  ;;  %s794_s24 = scalar_lea.vmem %s2458_s5, %s1571_s17  ;;  %1597 = vmatprep.subr.bf16.mxu0 %v1931_v0  ;;  %s2461_s5 = sld [smem:[#allocation17_spill]]  ;;  %vm997_vm4 = vcmask 1043456  }
  0x3e   : > { %v1763_v1 = vld [vmem:[%s794_s24 + $0x8] sm:$0xff]   ;;  %s724_s0 = scalar_lea.vmem %s2459_s28, %s1571_s17  ;;  %1609 = vmatprep.mubr.msk.bf16.mxu1 %vm1932_vm0, %v1931_v0  ;;  %1601 = vmatprep.mubr.msk.bf16.mxu0 %vm1932_vm0, %v1931_v0  ;;  %v1765_v3 = vld [vmem:[%s794_s24] sm:$0xff]   ;;  %s2464_s24 = sld [smem:[#allocation21_spill]] }
  0x3f   : > { %v1764_v2 = vld [vmem:[%s724_s0 + $0x8] sm:$0xff]   ;;  %1606 = vmatpush3.bf16.msra.mxu1 %v1763_v1  ;;  %s2182_s19 = scalar_lea.vmem %s2460_s7, %s1571_s17  ;;  %v1766_v4 = vld [vmem:[%s724_s0] sm:$0xff]   ;;  %s2462_s7 = sld [smem:[#allocation18_spill]] }
  0x40   : > { %1598 = vmatpush3.bf16.msra.mxu0 %v1764_v2  ;;  %1607 = vmatprep.subr.bf16.mxu1 %v1931_v0  ;;  %s700_s28 = scalar_select %p699_p2, %s1917_s26, 1  ;;  %v1767_v24 = vld [vmem:[%s2182_s19 + $0x8] sm:$0xff]   ;;  %v1768_v25 = vld [vmem:[%s2182_s19] sm:$0xff]  }
  0x41   : > { %1599 = vmatprep.subr.bf16.mxu0 %v1931_v0  ;;  %s2467_s9 = sld [smem:[#allocation26_spill]] }
  0x42   : > { %s2187_s21 = sshll.u32 %s700_s28, 3  ;;  %s2468_s10 = sld [smem:[#allocation27_spill]] (!%p1547_p5) }
  0x43   : > { %1608 = vmatpush3.bf16.msra.mxu1 %v1765_v3  ;;  %s702_s17 = scalar_lea.vmem %s2461_s5, %s2187_s21  ;;  %s716_s5 = scalar_lea.vmem %s2465_s20, %s2187_s21 }
  0x44   : > { %1600 = vmatpush3.bf16.msra.mxu0 %v1766_v4  ;;  %1621 = vmatprep.subr.bf16.mxu1 %v1931_v0  ;;  %v718_v5 = vld [vmem:[%s702_s17] sm:$0xff]  ;;  %s729_s30 = scalar_lea.vmem %s2464_s24, %s1913_s3  ;;  %s691_s20 = scalar_lea.vmem [#allocation3], %s2169_s29 }
  0x45   : > { %s709_s25 = scalar_lea.vmem %s2462_s7, %s2187_s21  ;;  %1613 = vmatprep.subr.bf16.mxu0 %v1931_v0  ;;  %v720_v7 = vpack.c.bf16 %v718_v5, %v718_v5  ;;  %v1529_v14 = vld [vmem:[%s729_s30] ss:$0 sm:$0xff]  ;;  %s1545_s21 = sshll.u32 %s1913_s3, 2 }
  0x46   : > { %v2198_v6 = vld [vmem:[%s709_s25] sm:$0xff]  ;;  %s799_s25 = scalar_lea.vmem %s2463_s6, %s1913_s3  ;;  %s2422_s30 = sand.u32 1, %s1893_s22  }
  0x47   : > { %v721_v8 = vpack.c.bf16 %v2198_v6, %v2198_v6  ;;  %1610 = vmatmul.mubr.msk.bf16.vlgmr.msra.gmra.mxu1 %vm749_vm1, %v720_v7  ;;  %v1534_v9 = vld [vmem:[%s799_s25] ss:$0 sm:$0xff]  ;;  %s868_s25 = scalar_lea.vmem %s2466_s8, %s1913_s3  ;;  %s1043_s24 = scalar_lea.vmem %s2467_s9, %s1545_s21 }
  0x48   : > { %1623 = vmatprep.mubr.msk.bf16.mxu1 %vm1932_vm0, %v1931_v0  ;;  %v977_v26 = vld [vmem:[%s716_s5] sm:$0xff]  ;;  %s2248_s17 = sshll.u32 %s2422_s30, 3 }
  0x49   : > { %1602 = vmatmul.mubr.msk.bf16.vlgmr.msra.gmra.mxu0 %vm749_vm1, %v721_v8  ;;  %vm978_vm3 = vcmp.eq.f32.partialorder %v977_v26, 0.0  ;;  %v1539_v33 = vld [vmem:[%s868_s25] ss:$0 sm:$0xff]  ;;  %s2423_s16 = scalar_lea.vmem [#allocation5], %s2248_s17 }
  0x4a   : > { %1617 = vmatprep.mubr.msk.bf16.mxu0 %vm1932_vm0, %v1931_v0  ;;  %1614 = vmatpush3.bf16.msra.mxu0 %v1767_v24  ;;  %v1044_v46 = vld [vmem:[%s1043_s24] sm:$0xf] }
  0x4b   : > { %1615 = vmatprep.subr.bf16.mxu0 %v1931_v0  ;;  %v1049_v47 = vsel %vm997_vm4, %v1044_v46, 0 }
  0x4e   : > { %1616 = vmatpush3.bf16.msra.mxu0 %v1768_v25 }
  0x4f   : > { %1627 = vmatprep.subr.bf16.mxu0 %v1931_v0 }
  0x51   : > { %1618 = vmatmul.mubr.msk.bf16.vlgmr.msra.gmra.mxu0 %vm749_vm1, %v720_v7 }
  0x52   : > { %1629 = vmatprep.mubr.msk.bf16.mxu0 %vm1932_vm0, %v1931_v0 }
 0x107   : > { %v856_v10 = vpop.f32.mrf.mxu1 }
 0x108   : > { %v857_v12 = vadd.f32 %v1534_v9, %v856_v10 }
 0x109   : > { %v787_v11 = vpop.f32.mrf.mxu0  ;;  %v1611_v13 = vpop.f32.mrf.mxu1 }
 0x10a   : > { %v929_v16 = vpack.c.bf16 %v857_v12, %v857_v12  ;;  %v788_v20 = vadd.f32 %v1529_v14, %v787_v11 }
 0x10b   : > { %v1603_v15 = vpop.f32.mrf.mxu0  ;;  %v859_v17 = vpop.f32.mrf.mxu1 }
 0x10c   : > { %v935_v19 = vsel %vm930_vm2, %v929_v16, 0  ;;  %v928_v23 = vpack.c.bf16 %v788_v20, %v788_v20 }
 0x10d   : > { %v790_v18 = vpop.f32.mrf.mxu0  ;;  %v1612_v21 = vpop.f32.mrf.mxu1  ;;  %1622 = vmatpush3.bf16.xpose.msra.mxu1 %v935_v19 }
 0x10e   : > { %1633 = vmatprep.subr.bf16.mxu1 %v1931_v0 }
 0x10f   : > { %v1604_v22 = vpop.f32.mrf.mxu0 }
 0x111   : > { %v922_v34 = vpop.f32.mrf.mxu0 }
 0x112   : > { %v923_v35 = vadd.f32 %v1539_v33, %v922_v34 }
 0x113   : > { %v1619_v36 = vpop.f32.mrf.mxu0 }
 0x114   : > { %1624 = vmatmul.mubr.msk.bf16.vlgmr.msra.gmra.mxu1 %vm930_vm2, %v928_v23  ;;  %v993_v37 = vpack.c.bf16 %v923_v35, %v923_v35 }
 0x115   : > { %1635 = vmatprep.mubr.msk.bf16.mxu1 %vm1932_vm0, %v1931_v0  ;;  %v925_v38 = vpop.f32.mrf.mxu0  ;;  %1634 = vmatpush3.bf16.msra.mxu1 %v1049_v47 }
 0x116   : > { %v999_v39 = vsel %vm997_vm4, %v993_v37, 0 }
 0x117   : > { %v1620_v40 = vpop.f32.mrf.mxu0  ;;  %1628 = vmatpush3.bf16.msra.mxu0 %v999_v39 }
 0x1d4   : > { %v971_v27 = vpop.f32.mrf.mxu1 }
 0x1d5   : > { %v979_v28 = vsel %vm978_vm3, -1e+09, %v971_v27 }
 0x1d6   : > { %v1625_v29 = vpop.f32.mrf.mxu1  ;;  %v980_v30 = vsel %vm930_vm2, %v979_v28, -inf }
 0x1d7   : > { %981 = vmax.xlane.f32.xlu0 %v980_v30 }
 0x1d8   : > { %v974_v31 = vpop.f32.mrf.mxu1 }
 0x1da   : > { %v1626_v32 = vpop.f32.mrf.mxu1 }
 0x260   : > { %v982_v41 = vpop.xlane.xlu0 %981 }
 0x261   : > { %v983_v42 = vsub.f32 %v979_v28, %v982_v41 }
 0x263   : > { %v984_v43 = vmul.f32 1.442695, %v983_v42 }
 0x265   : > { %1769 = vpow2.f32 %v984_v43 }
 0x272   : > { %v1770_v44 = vpop.eup %1769 }
 0x273   : > { %v986_v45 = vsel %vm930_vm2, %v1770_v44, 0.0 }
 0x274   : > { %987 = vadd.xlane.f32.xlu0 %v986_v45 }
 0x2fd   : > { %v988_v48 = vpop.xlane.xlu0 %987 }
 0x2fe   : > { %1771 = vrcp.f32 %v988_v48 }
 0x30b   : > { %v1772_v49 = vpop.eup %1771 }
 0x30c   : > { %v990_v50 = vmul.f32 %v1772_v49, %v1770_v44 }
 0x30e   : > { %991 = vst.msk [vmem:[%s2423_s16] sm:$0xff] %vm930_vm2, %v990_v50  ;;  %v992_v51 = vpack.c.bf16 %v990_v50, %v990_v50 }
 0x310   : > { %1630 = vmatmul.mubr.msk.bf16.vlgmr.msra.gmra.mxu0 %vm930_vm2, %v992_v51 }
 0x3d0   : > { %v1035_v52 = vpop.f32.mrf.mxu0 }
 0x3d1   : > { %v1041_v53 = vpack.c.bf16 %v1035_v52, %v1035_v52 }
 0x3d2   : > { %v1631_v54 = vpop.f32.mrf.mxu0 }
 0x3d3   : > { %1636 = vmatmul.mubr.msk.bf16.vlgmr.msra.gmra.mxu1 %vm930_vm2, %v1041_v53 }
 0x3d4   : > { %v1038_v55 = vpop.f32.mrf.mxu0 }
 0x3d6   : > { %v1632_v56 = vpop.f32.mrf.mxu0 }
 0x493   : > { %v1085_v57 = vpop.f32.mrf.mxu1 }
 0x495   : > { %v1637_v58 = vpop.f32.mrf.mxu1  ;;  %1094 = sbr.rel (%p1547_p5) target bundleno = 1180 (0x49c), region = 100 }
 0x497   : > { %v1088_v59 = vpop.f32.mrf.mxu1 }
 0x499   : > { %v1638_v60 = vpop.f32.mrf.mxu1 }
 0x49a   : > { %v1548_v61 = vld [vmem:[%s2468_s10] ss:$0 sm:$0xff] }
 0x49b   : > { %1102 = vst.msk [vmem:[#allocation2] sm:$0xff] %vm749_vm1, %v1548_v61 }
 0x49c PF: > { %p1549_p6 = scmp.ne.s32.totalorder %s1913_s3, 3 }
 0x49d   : > { %s2469_s13 = sld [smem:[#allocation30_spill]] (!%p1549_p6) }
 0x49e   : > { %s2470_s11 = sld [smem:[#allocation28_spill]] (!%p1549_p6) }
 0x49f   : > { %s2471_s28 = sld [smem:[#allocation29_spill]] (!%p1549_p6) }
 0x4a0   : > { %s2472_s21 = sld [smem:[#allocation31_spill]] (!%p1549_p6) }
 0x4a1   : > { %1109 = sbr.rel (%p1549_p6) target bundleno = 1940 (0x794), region = 104  ;;  %s2473_s24 = sld [smem:[#allocation32_spill]] (!%p1549_p6) }
 0x4a2   : > { %v1103_v62 = vld [vmem:[#allocation2] sm:$0xff]  ;;  %s2474_s19 = sld [smem:[#allocation33_spill]] (!%p1549_p6) }
 0x4a3   : > { %v1104_v63 = vadd.f32 %v1103_v62, %v1085_v57 }
 0x4a5   : > { %1105 = vst.msk [vmem:[#allocation2] sm:$0xff] %vm749_vm1, %v1104_v63 }
 0x4a6   : > { %v1773_v5 = vld [vmem:[%s2469_s13 + $0x8] sm:$0xff]   ;;  %v1933_v7 = vmov 0.0   ;;  %vm1934_vm5 = vmmov 0   ;;  %v1775_v8 = vld [vmem:[%s2405_s15 + $0x18] sm:$0xff]   ;;  %v1776_v9 = vld [vmem:[%s2405_s15 + $0x10] sm:$0xff]   ;;  %vm1253_vm6 = vcmask 523264  }
 0x4a7   : > { %1639 = vmatprep.subr.bf16.mxu0 %v1933_v7  ;;  %1643 = vmatprep.mubr.msk.bf16.mxu0 %vm1934_vm5, %v1933_v7  ;;  %v1550_v20 = vld [vmem:[%s2470_s11] ss:$0 sm:$0xff]  ;;  %v1777_v26 = vld [vmem:[%s2405_s15 + $0x8] sm:$0xff]  }
 0x4a8   : > { %1640 = vmatpush3.bf16.msra.mxu0 %v1773_v5  ;;  %1647 = vmatprep.subr.bf16.mxu1 %v1933_v7  ;;  %v1551_v22 = vld [vmem:[%s2471_s28] ss:$0 sm:$0xff] }
 0x4a9   : > { %1641 = vmatprep.subr.bf16.mxu0 %v1933_v7  ;;  %1655 = vmatprep.mubr.msk.bf16.mxu1 %vm1934_vm5, %v1933_v7  ;;  %v1778_v27 = vld [vmem:[%s2405_s15] sm:$0xff]  }
 0x4aa   : > { %1648 = vmatpush3.bf16.msra.mxu1 %v1775_v8  ;;  %v1552_v28 = vld [vmem:[%s2472_s21] ss:$0 sm:$0xff]  ;;  %s2475_s21 = sld [smem:[#allocation34_spill]] }
 0x4ab   : > { %1649 = vmatprep.subr.bf16.mxu1 %v1933_v7  ;;  %v1556_v36 = vld [vmem:[%s2473_s24] ss:$0 sm:$0xff] }
 0x4ac   : > { %v1110_v0 = vld [vmem:[#allocation2] sm:$0xff] }
 0x4ad   : > { %v1111_v1 = vadd.f32 %v1110_v0, %v2198_v6  ;;  %v1774_v6 = vld [vmem:[%s2469_s13] sm:$0xff]  }
 0x4ae   : > { %1642 = vmatpush3.bf16.msra.mxu0 %v1774_v6  ;;  %1650 = vmatpush3.bf16.msra.mxu1 %v1776_v9  ;;  %v1562_v56 = vld [vmem:[%s2474_s19] ss:$0 sm:$0xff] }
 0x4af   : > { %v1114_v2 = vsel %vm749_vm1, %v1111_v1, 0.0  ;;  %v1119_v3 = vmul.f32 %v1111_v1, %v1111_v1  ;;  %1651 = vmatprep.subr.bf16.mxu1 %v1933_v7 }
 0x4b0   : > { %1115 = vadd.xlane.f32.xlu0 %v1114_v2  ;;  %v1563_v58 = vld [vmem:[%s2475_s21] ss:$0 sm:$0xff] }
 0x4b1   : > { %v1120_v4 = vsel %vm749_vm1, %v1119_v3, 0.0 }
 0x4b2   : > { %1652 = vmatpush3.bf16.msra.mxu1 %v1777_v26 }
 0x4b3   : > { %1653 = vmatprep.subr.bf16.mxu1 %v1933_v7 }
 0x4b4   : > { %1121 = vadd.xlane.f32.xlu0 %v1120_v4 }
 0x4b6   : > { %1654 = vmatpush3.bf16.msra.mxu1 %v1778_v27 }
 0x539   : > { %v1116_v10 = vpop.xlane.xlu0 %1115 }
 0x53a   : > { %v1118_v11 = vmul.f32 0.03125, %v1116_v10 }
 0x53c   : > { %v1124_v13 = vmul.f32 %v1118_v11, %v1118_v11  ;;  %v1127_v18 = vsub.f32 %v1111_v1, %v1118_v11 }
 0x53d   : > { %v1122_v12 = vpop.xlane.xlu0 %1121 }
 0x53e   : > { %v1123_v14 = vmul.f32 0.03125, %v1122_v12 }
 0x540   : > { %v1125_v15 = vsub.f32 %v1123_v14, %v1124_v13 }
 0x542   : > { %v1126_v16 = vmax.f32 %v1125_v15, 0.0 }
 0x544   : > { %v1128_v17 = vadd.f32 1e-06, %v1126_v16 }
 0x546   : > { %1779 = vrsqrt.f32 %v1128_v17 }
 0x553   : > { %v1780_v19 = vpop.eup %1779 }
 0x554   : > { %v1130_v21 = vmul.f32 %v1780_v19, %v1127_v18 }
 0x556   : > { %v1137_v23 = vmul.f32 %v1550_v20, %v1130_v21 }
 0x558   : > { %v1144_v24 = vadd.f32 %v1551_v22, %v1137_v23 }
 0x55a   : > { %v1145_v25 = vpack.c.bf16 %v1144_v24, %v1144_v24 }
 0x55c   : > { %1644 = vmatmul.mubr.msk.bf16.vlgmr.msra.gmra.mxu0 %vm749_vm1, %v1145_v25 }
 0x61c   : > { %v1206_v29 = vpop.f32.mrf.mxu0 }
 0x61d   : > { %v1207_v30 = vadd.f32 %v1552_v28, %v1206_v29 }
 0x61e   : > { %v1645_v31 = vpop.f32.mrf.mxu0 }
 0x61f   : > { %v1212_v32 = vmax.f32 %v1207_v30, 0.0 }
 0x620   : > { %v1209_v33 = vpop.f32.mrf.mxu0 }
 0x621   : > { %v1213_v34 = vpack.c.bf16 %v1212_v32, %v1212_v32 }
 0x622   : > { %v1646_v35 = vpop.f32.mrf.mxu0 }
 0x623   : > { %1656 = vmatmul.mubr.msk.bf16.vlgmr.msra.gmra.mxu1 %vm1253_vm6, %v1213_v34 }
 0x6e3   : > { %v1291_v37 = vpop.f32.mrf.mxu1 }
 0x6e4   : > { %v1292_v38 = vadd.f32 %v1556_v36, %v1291_v37 }
 0x6e5   : > { %v1657_v39 = vpop.f32.mrf.mxu1 }
 0x6e6   : > { %v1297_v40 = vadd.f32 %v1292_v38, %v1144_v24 }
 0x6e7   : > { %v1294_v41 = vpop.f32.mrf.mxu1 }
 0x6e8   : > { %v1300_v42 = vsel %vm749_vm1, %v1297_v40, 0.0  ;;  %v1304_v43 = vmul.f32 %v1297_v40, %v1297_v40 }
 0x6e9   : > { %1301 = vadd.xlane.f32.xlu1 %v1300_v42  ;;  %v1658_v44 = vpop.f32.mrf.mxu1 }
 0x6ea   : > { %v1305_v45 = vsel %vm749_vm1, %v1304_v43, 0.0 }
 0x6ed   : > { %1306 = vadd.xlane.f32.xlu1 %v1305_v45 }
 0x772   : > { %v1302_v46 = vpop.xlane.xlu1 %1301 }
 0x773   : > { %v1303_v47 = vmul.f32 0.03125, %v1302_v46 }
 0x775   : > { %v1309_v49 = vmul.f32 %v1303_v47, %v1303_v47  ;;  %v1312_v54 = vsub.f32 %v1297_v40, %v1303_v47 }
 0x776   : > { %v1307_v48 = vpop.xlane.xlu1 %1306 }
 0x777   : > { %v1308_v50 = vmul.f32 0.03125, %v1307_v48 }
 0x779   : > { %v1310_v51 = vsub.f32 %v1308_v50, %v1309_v49 }
 0x77b   : > { %v1311_v52 = vmax.f32 %v1310_v51, 0.0 }
 0x77d   : > { %v1313_v53 = vadd.f32 1e-06, %v1311_v52 }
 0x77f   : > { %1781 = vrsqrt.f32 %v1313_v53 }
 0x78c   : > { %v1782_v55 = vpop.eup %1781 }
 0x78d   : > { %v1315_v57 = vmul.f32 %v1782_v55, %v1312_v54 }
 0x78f   : > { %v1322_v59 = vmul.f32 %v1562_v56, %v1315_v57 }
 0x791   : > { %v1329_v60 = vadd.f32 %v1563_v58, %v1322_v59 }
 0x793   : > { %1330 = vst.msk [vmem:[%s691_s20] sm:$0xff] %vm749_vm1, %v1329_v60 }
 0x794 PF: > { %s1566_s28 = sshll.u32 %s1917_s26, 7  ;;  %s2477_s30 = sld [smem:[#allocation35_spill]] }
 0x795   : > { %s1351_s19 = sshll.u32 %s691_s20, 4  ;;  %s2478_s7 = sand.u32 1, %s1905_s2   ;;  %s1352_s19 = int_to_ptr.vmem [resolvable:$true] %s1351_s19 }
 0x796   : > { %s1332_s25 = scalar_lea.sflag [#allocation4], %s2478_s7  ;;  %s1783_s21 = scalar_lea.vmem %s1352_s19, 128 }
 0x797   : > { %p1784_p8 = scmp.ne.s32.totalorder %s1352_s19, %s1783_s21  ;;  %s1935_s6 = smov [#allocation3]  }
 0x798   : > { %s1787_s8 = sshll.u32 %s1935_s6, 4  ;;  %s1788_s8 = int_to_ptr.vmem [resolvable:$false] %s1787_s8 }
 0x799   : > { %p1785_p9 = pnand %p1784_p8, %p2113_p3  ;;  %s1789_s9 = scalar_lea.vmem %s1788_s8, 256 }
 0x79a   : > { %s1349_s5 = scalar_lea.hbm %s2477_s30, %s1566_s28  ;;  %p1790_p11 = scmp.lt.s32.totalorder %s1352_s19, %s1788_s8 }
 0x79b   : > { %p1786_p10 = pneg %p1785_p9  ;;  %p1791_p0 = scmp.lt.s32.totalorder %s1789_s9, %s1783_s21 }
 0x79d   : > { %p1792_p1 = por %p1791_p0, %p1790_p11 }
 0x79f   : > { %p1793_p4 = pnand %p1792_p1, %p1786_p10 }
 0x7a1   : > { %1796 = shalt.err (!%p1793_p4)
}
 0x7a2   : > { %s1797_s16 = scalar_lea.hbm %s1349_s5, 128  ;;  %s1801_s28 = scalar_lea.hbm %s2477_s30, 256 }
 0x7a3   : > { %p1798_p2 = scmp.ne.s32.totalorder %s1349_s5, %s1797_s16  ;;  %p1802_p8 = scmp.lt.s32.totalorder %s1349_s5, %s2477_s30 }
 0x7a4   : > { %p1803_p9 = scmp.lt.s32.totalorder %s1801_s28, %s1797_s16 }
 0x7a5   : > { %p1799_p5 = pnand %p1798_p2, %p2113_p3 }
 0x7a6   : > { %p1804_p13 = por %p1803_p9, %p1802_p8 }
 0x7a7   : > { %p1800_p6 = pneg %p1799_p5 }
 0x7a9   : > { %p1805_p7 = pnand %p1804_p13, %p1800_p6 }
 0x7ab   : > { %1808 = shalt.err (!%p1805_p7)
}
 0x7ac   : > { %1659 = dma.vmem_to_hbm [thread:$0]  (%p2113_p3), %s1352_s19, 128, %s1349_s5, %s1332_s25  }
 0x7ad   : > { %s1567_s6 = sshll.u32 %s1917_s26, 2  ;;  %s2479_s8 = scalar_lea.vmem [#allocation5], %s2248_s17 }
 0x7ae   : > { %s1367_s9 = sshll.u32 %s2479_s8, 4  ;;  %s1363_s21 = sadd.s32 %s1913_s3, %s1567_s6  ;;  %s1368_s9 = int_to_ptr.vmem [resolvable:$true] %s1367_s9 }
 0x7af   : > { %s1568_s29 = sshll.u32 %s1363_s21, 7  ;;  %s2480_s16 = sld [smem:[#allocation36_spill]] }
 0x7b0   : > { %s2481_s7 = sand.u32 1, %s1893_s22   ;;  %s1809_s11 = scalar_lea.vmem %s1368_s9, 128 }
 0x7b1   : > { %s1337_s10 = scalar_lea.sflag [#allocation6], %s2481_s7  ;;  %p1810_p7 = scmp.ne.s32.totalorder %s1368_s9, %s1809_s11 }
 0x7b2   : > { %s1936_s0 = smov [#allocation5]  }
 0x7b3   : > { %p1811_p13 = pnand %p1810_p7, %p2142_p12  ;;  %s1813_s13 = sshll.u32 %s1936_s0, 4  ;;  %s1814_s13 = int_to_ptr.vmem [resolvable:$false] %s1813_s13 }
 0x7b4   : > { %s1815_s26 = scalar_lea.vmem %s1814_s13, 256  ;;  %p1816_p3 = scmp.lt.s32.totalorder %s1368_s9, %s1814_s13 }
 0x7b5   : > { %s1365_s28 = scalar_lea.hbm %s2480_s16, %s1568_s29  ;;  %p1812_p10 = pneg %p1811_p13 }
 0x7b6   : > { %p1817_p11 = scmp.lt.s32.totalorder %s1815_s26, %s1809_s11 }
 0x7b8   : > { %p1818_p0 = por %p1817_p11, %p1816_p3 }
 0x7ba   : > { %p1819_p1 = pnand %p1818_p0, %p1812_p10 }
 0x7bc   : > { %1822 = shalt.err (!%p1819_p1)
}
 0x7bd   : > { %s1823_s3 = scalar_lea.hbm %s1365_s28, 128  ;;  %s1827_s19 = scalar_lea.hbm %s2480_s16, 1024 }
 0x7be   : > { %p1824_p4 = scmp.ne.s32.totalorder %s1365_s28, %s1823_s3  ;;  %p1828_p6 = scmp.lt.s32.totalorder %s1365_s28, %s2480_s16 }
 0x7bf   : > { %p1829_p8 = scmp.lt.s32.totalorder %s1827_s19, %s1823_s3 }
 0x7c0   : > { %p1825_p2 = pnand %p1824_p4, %p2142_p12 }
 0x7c1   : > { %p1830_p9 = por %p1829_p8, %p1828_p6 }
 0x7c2   : > { %p1826_p5 = pneg %p1825_p2 }
 0x7c4   : > { %p1831_p7 = pnand %p1830_p9, %p1826_p5 }
 0x7c6   : > { %1834 = shalt.err (!%p1831_p7)
}
 0x7c7   : > { %1660 = dma.vmem_to_hbm [thread:$0]  (%p2142_p12), %s1368_s9, 128, %s1365_s28, %s1337_s10  }
 0x7c8 PF: > { %s2482_s11 = sld [smem:[#allocation9_spill]]  ;;  %p1670_p13 = scmp.ge.s32.totalorder %s1929_s4, 2 }
 0x7c9   : > { %p2483_p10 = scmp.ne.s32.totalorder %s2454_s14, 0 }
 0x7cb   : > { %p1664_p3 = pnand %p1670_p13, %p2483_p10 }
 0x7cd   : > { %p1665_p11 = pneg %p1664_p3 }
 0x7ce   : > { %s1379_s13 = sand.u32 1, %s2482_s11  }
 0x7cf   : > { %s1380_s8 = scalar_lea.sflag [#allocation4], %s1379_s13 }
 0x7d0   : > { %1880 = dma.done.wait (%p1665_p11), %s1380_s8, 128  }
 0x7d1   : > { %1882 = vsyncadd (%p1665_p11), %s1380_s8, 4294967168  ;;  %s1388_s21 = sand.u32 1, %s1889_s1   ;;  %p2484_p0 = scmp.ne.s32.totalorder %s2457_s12, 0 }
 0x7d2   : > { %s1389_s18 = scalar_lea.sflag [#allocation6], %s1388_s21 }
 0x7d3   : > { %p1667_p1 = pnand %p1670_p13, %p2484_p0 }
 0x7d5   : > { %p1668_p4 = pneg %p1667_p1 }
 0x7d7   : > { %1884 = dma.done.wait (%p1668_p4), %s1389_s18, 128  }
 0x7d8   : > { %1886 = vsyncadd (%p1668_p4), %s1389_s18, 4294967168  ;;  %s37_s4 = sadd.s32 1, %s1929_s4   ;;  %s2485_s10 = sld [smem:[#allocation10_spill]] }
 0x7d9   : > { %p34_p12 = scmp.ge.s32.totalorder %s37_s4, 10   ;;  %s2486_s25 = sld [smem:[#allocation16_spill]] }
 0x7da   : > { %s2487_s3 = sld [smem:[#allocation11_spill]]  ;;  %s2491_s1 = smov %s1893_s22 }
 0x7db   : > { %s2488_s26 = sld [smem:[#allocation12_spill]]  ;;  %s2492_s22 = smov %s1897_s23 }
 0x7dc   : > { %s2489_s14 = sld [smem:[#allocation13_spill]]  ;;  %s2493_s23 = smov %s2150_s27 }
 0x7dd   : > { %s2490_s28 = sld [smem:[#allocation15_spill]]  ;;  %s2494_s24 = smov %s1905_s2 }
 0x7de   : > { %s2495_s2 = smov %s2485_s10  ;;  %36 = sbr.rel (!%p34_p12) target bundleno = 30 (0x1e), region = 169 }
 0x7e2   : > { %s2496_s27 = smov %s2489_s14 }
 0x7e3   :  { %1394 = vsyncpa [#allocation4], 1 }
 0x7e4   :  { %1396 = vsyncpa [#allocation4 + $0x1], 1 }
 0x7e5   :  { %1397 = vsyncpa [#allocation6], 1 }
 0x7e6   :  { %1399 = vsyncpa [#allocation6 + $0x1], 1 }

</bundles_post_ra>
